<compile_context>
chip_gen: v6e
topology: v6e:2x2x1
jax: 0.10.0
libtpu: 0.0.40
codegen_flags: <defaults>
</compile_context>

<pallas_src>
import functools

import jax
import jax.numpy as jnp
from jax.experimental import pallas as pl
from jax.experimental.pallas import tpu as pltpu

LANES = 128
SUBLANES = 8
VREG_ELEMS = SUBLANES * LANES            # 1024
TARGET_BLOCK_BYTES = 4 * 1024 * 1024     # ~4 MiB per input per grid step
MAX_ACC_ROWS = 64                        # (64, 128) f32 accumulator = 32 KiB


def _largest_divisor_leq(n, cap):
    for r in range(min(cap, n), 0, -1):
        if n % r == 0:
            return r
    return 1


def _rmse_kernel(yhat_ref, y_ref, o_ref, acc_ref, *,
                 n_elems, eps, rows, block_rows, acc_rows, needs_mask):
    i = pl.program_id(0)
    last = pl.num_programs(0) - 1

    @pl.when(i == 0)
    def _():
        acc_ref[...] = jnp.zeros_like(acc_ref)

    # Upcast on the VPU (free for a mem-bound kernel); squared error.
    d = yhat_ref[...].astype(jnp.float32) - y_ref[...].astype(jnp.float32)
    sq = d * d

    def accumulate(vals):
        # Fold the block into the (acc_rows, 128) accumulator: acc_rows/8
        # independent vreg add chains, pure VPU (no per-step XLU reduce).
        # The reshape splits only the leading sublane dim -> layout-preserving.
        acc_ref[...] += jnp.sum(
            vals.reshape(block_rows // acc_rows, acc_rows, LANES), axis=0)

    if needs_mask:
        # Only the final block can be partial; keep the steady state free of
        # iota/compare/select work.
        @pl.when(i != last)
        def _():
            accumulate(sq)

        @pl.when(i == last)
        def _():
            row_ids = (jax.lax.broadcasted_iota(
                jnp.int32, (block_rows, LANES), 0) + i * block_rows)
            accumulate(jnp.where(row_ids < rows, sq, jnp.float32(0.0)))
    else:
        accumulate(sq)

    @pl.when(i == last)
    def _():
        # Single final cross-lane reduce + mean + eps + sqrt.
        mse = jnp.sum(acc_ref[...]) * jnp.float32(1.0 / n_elems)
        o_ref[0, 0] = jnp.sqrt(mse + jnp.float32(eps))


def rmse_loss(yhat, y, eps=1e-6):
    assert yhat.shape == y.shape, "yhat and y must have the same shape"
    n_elems = yhat.size

    # Flatten in the native dtype (no wrapper upcast -> no extra HBM traffic).
    yhat_f = jnp.ravel(yhat)
    y_f = jnp.ravel(y)

    if n_elems % LANES == 0:
        padded = n_elems                         # zero-copy path
    else:
        # A copy is unavoidable here (a prefix slice feeding the custom call
        # would materialize one as well), so keep the pad but round up to a
        # full (8,128) vreg, which keeps rows a multiple of 8.  Zeros
        # contribute nothing to the squared-error sum.
        padded = pl.cdiv(n_elems, VREG_ELEMS) * VREG_ELEMS
        pad = padded - n_elems
        yhat_f = jnp.pad(yhat_f, (0, pad))
        y_f = jnp.pad(y_f, (0, pad))

    rows = padded // LANES
    yhat2d = yhat_f.reshape(rows, LANES)
    y2d = y_f.reshape(rows, LANES)

    # ~4 MiB of the native dtype per input per step: 8192 rows for f32,
    # 16384 for bf16, ... (always a multiple of 64 sublanes -> valid for
    # packed dtypes).
    itemsize = max(yhat.dtype.itemsize, 1)
    max_block_rows = max(TARGET_BLOCK_BYTES // (LANES * itemsize), MAX_ACC_ROWS)
    block_rows = min(max_block_rows, rows)
    grid = (pl.cdiv(rows, block_rows),)
    needs_mask = (rows % block_rows) != 0        # static: partial last block?

    # Accumulator height: 64 whenever block_rows allows it (always true in
    # the multi-block regime); otherwise the largest divisor (tiny inputs).
    acc_rows = _largest_divisor_leq(block_rows, MAX_ACC_ROWS)

    kernel = functools.partial(
        _rmse_kernel, n_elems=n_elems, eps=eps, rows=rows,
        block_rows=block_rows, acc_rows=acc_rows, needs_mask=needs_mask)

    out = pl.pallas_call(
        kernel,
        out_shape=jax.ShapeDtypeStruct((1, 1), jnp.float32),
        grid_spec=pltpu.PrefetchScalarGridSpec(
            num_scalar_prefetch=0,
            grid=grid,
            in_specs=[
                # TODO(synk): sweep pipeline_mode=pl.Buffered(3) on v7x once
                # hardware measurement is available (low priority).
                pl.BlockSpec((block_rows, LANES), lambda i: (i, 0)),
                pl.BlockSpec((block_rows, LANES), lambda i: (i, 0)),
            ],
            out_specs=pl.BlockSpec(
                (1, 1), lambda i: (0, 0), memory_space=pltpu.SMEM),
            scratch_shapes=[pltpu.VMEM((acc_rows, LANES), jnp.float32)],
        ),
        compiler_params=pltpu.CompilerParams(
            dimension_semantics=("arbitrary",),
            # 2 inputs x 2 pipeline buffers x ~4 MiB = ~16 MiB: above v5e's
            # 16 MiB default scoped limit, comfortably under v7x's 64 MiB
            # physical VMEM.
            vmem_limit_bytes=32 * 1024 * 1024,
        ),
    )(yhat2d, y2d)

    # TODO(synk): optional v7x 2-TensorCore split (leading size-2 "parallel"
    # grid axis with per-core partial sums combined in the wrapper) if a
    # single TC's DMA engines can't saturate chip HBM bandwidth.
    return out[0, 0]


if __name__ == "__main__":
    key = jax.random.PRNGKey(0)
    k1, k2 = jax.random.split(key)

    # Small NCHW-ish shapes consistent with a typical regression target.
    yhat = jax.random.normal(k1, (2, 4, 16, 16), dtype=jnp.float32)
    y = jax.random.normal(k2, (2, 4, 16, 16), dtype=jnp.float32)
    loss = rmse_loss(yhat, y, eps=1e-6)
    jax.block_until_ready(loss)
    ref = jnp.sqrt(jnp.mean((yhat - y) ** 2) + 1e-6)
    assert jnp.allclose(loss, ref, rtol=1e-5, atol=1e-6), (loss, ref)

    # Non-lane-aligned small size: exercises the padded path.
    a1 = jax.random.normal(k1, (3, 7, 33, 65), dtype=jnp.float32)
    a2 = jax.random.normal(k2, (3, 7, 33, 65), dtype=jnp.float32)
    loss_a = rmse_loss(a1, a2, eps=1e-6)
    jax.block_until_ready(loss_a)
    ref_a = jnp.sqrt(jnp.mean((a1 - a2) ** 2) + 1e-6)
    assert jnp.allclose(loss_a, ref_a, rtol=1e-5, atol=1e-6), (loss_a, ref_a)

    # Medium multi-block, unaligned size: exercises the multi-step pipeline
    # and the last-step-only masked accumulate.
    b1 = jax.random.normal(k1, (1200, 1037), dtype=jnp.float32)
    b2 = jax.random.normal(k2, (1200, 1037), dtype=jnp.float32)
    loss_b = rmse_loss(b1, b2, eps=1e-6)
    jax.block_until_ready(loss_b)
    ref_b = jnp.sqrt(jnp.mean((b1 - b2) ** 2) + 1e-6)
    assert jnp.allclose(loss_b, ref_b, rtol=1e-4, atol=1e-6), (loss_b, ref_b)

    print("KERNEL_OK")
</pallas_src>

<mosaic_0001>
module attributes {stable_mosaic.version = 11 : i64} {
  func.func @_rmse_kernel(%arg0: i32, %arg1: memref<16x128xf32, #tpu.memory_space<vmem>>, %arg2: memref<16x128xf32, #tpu.memory_space<vmem>>, %arg3: memref<1x1xf32, #tpu.memory_space<smem>>, %arg4: memref<16x128xf32, #tpu.memory_space<vmem>>) attributes {dimension_semantics = [#tpu.dimension_semantics<arbitrary>], iteration_bounds = array<i64: 1>, scalar_prefetch = 0 : i64, scratch_operands = 1 : i64, tpu.core_type = #tpu.core_type<tc>, window_params = [{transform_indices = @transform_0, window_bounds = array<i64: 16, 128>}, {transform_indices = @transform_1, window_bounds = array<i64: 16, 128>}, {transform_indices = @transform_2, window_bounds = array<i64: 1, 1>}]} {
    %c0_i32 = arith.constant 0 : i32
    %0 = arith.cmpi eq, %arg0, %c0_i32 : i32
    %1 = arith.extui %0 : i1 to i32
    %c0_i32_0 = arith.constant 0 : i32
    %2 = arith.cmpi ne, %1, %c0_i32_0 : i32
    scf.if %2 {
      %cst_10 = arith.constant 0.000000e+00 : f32
      %15 = vector.broadcast %cst_10 : f32 to vector<16x128xf32>
      %c0_11 = arith.constant 0 : index
      %c0_12 = arith.constant 0 : index
      %16 = vector.load %arg4[%c0_11, %c0_12] : memref<16x128xf32, #tpu.memory_space<vmem>>, vector<16x128xf32>
      tpu.vector_store %arg4[%c0_11, %c0_12], %15 {strides = array<i32>} : memref<16x128xf32, #tpu.memory_space<vmem>>, vector<16x128xf32>,
    } else {
    }
    %c0 = arith.constant 0 : index
    %c0_1 = arith.constant 0 : index
    %3 = vector.load %arg1[%c0, %c0_1] : memref<16x128xf32, #tpu.memory_space<vmem>>, vector<16x128xf32>
    %c0_2 = arith.constant 0 : index
    %c0_3 = arith.constant 0 : index
    %4 = vector.load %arg2[%c0_2, %c0_3] : memref<16x128xf32, #tpu.memory_space<vmem>>, vector<16x128xf32>
    %5 = arith.subf %3, %4 : vector<16x128xf32>
    %6 = arith.mulf %5, %5 : vector<16x128xf32>
    %c0_4 = arith.constant 0 : index
    %c0_5 = arith.constant 0 : index
    %7 = vector.load %arg4[%c0_4, %c0_5] : memref<16x128xf32, #tpu.memory_space<vmem>>, vector<16x128xf32>
    %8 = vector.shape_cast %6 : vector<16x128xf32> to vector<1x16x128xf32>
    %cst = arith.constant dense<0.000000e+00> : vector<16x128xf32>
    %9 = vector.multi_reduction <add>, %8, %cst [0] : vector<1x16x128xf32> to vector<16x128xf32>
    %10 = arith.addf %7, %9 : vector<16x128xf32>
    %c0_6 = arith.constant 0 : index
    %c0_7 = arith.constant 0 : index
    %11 = vector.load %arg4[%c0_6, %c0_7] : memref<16x128xf32, #tpu.memory_space<vmem>>, vector<16x128xf32>
    tpu.vector_store %arg4[%c0_6, %c0_7], %10 {strides = array<i32>} : memref<16x128xf32, #tpu.memory_space<vmem>>, vector<16x128xf32>,
    %c0_i32_8 = arith.constant 0 : i32
    %12 = arith.cmpi eq, %arg0, %c0_i32_8 : i32
    %13 = arith.extui %12 : i1 to i32
    %c0_i32_9 = arith.constant 0 : i32
    %14 = arith.cmpi ne, %13, %c0_i32_9 : i32
    scf.if %14 {
      %c0_10 = arith.constant 0 : index
      %c0_11 = arith.constant 0 : index
      %15 = vector.load %arg4[%c0_10, %c0_11] : memref<16x128xf32, #tpu.memory_space<vmem>>, vector<16x128xf32>
      %16 = vector.shape_cast %15 : vector<16x128xf32> to vector<1x16x128xf32>
      %cst_12 = arith.constant dense<0.000000e+00> : vector<1xf32>
      %17 = vector.multi_reduction <add>, %16, %cst_12 [1, 2] : vector<1x16x128xf32> to vector<1xf32>
      %18 = vector.shape_cast %17 : vector<1xf32> to vector<1x1x1xf32>
      %19 = vector.extract %18[0, 0, 0] : f32 from vector<1x1x1xf32>
      %cst_13 = arith.constant 4.8828125E-4 : f32
      %20 = arith.mulf %19, %cst_13 : f32
      %cst_14 = arith.constant 9.99999997E-7 : f32
      %21 = arith.addf %20, %cst_14 : f32
      %22 = math.sqrt %21 : f32
      %c0_15 = arith.constant 0 : index
      %c0_16 = arith.constant 0 : index
      %23 = memref.load %arg3[%c0_15, %c0_16] : memref<1x1xf32, #tpu.memory_space<smem>>
      memref.store %22, %arg3[%c0_15, %c0_16] : memref<1x1xf32, #tpu.memory_space<smem>>
    } else {
    }
    return
  }
  func.func @transform_0(%arg0: i32) -> (i32, i32) {
    %c0_i32 = arith.constant 0 : i32
    %c0_i32_0 = arith.constant 0 : i32
    return %arg0, %c0_i32 : i32, i32
  }
  func.func @transform_1(%arg0: i32) -> (i32, i32) {
    %c0_i32 = arith.constant 0 : i32
    %c0_i32_0 = arith.constant 0 : i32
    return %arg0, %c0_i32 : i32, i32
  }
  func.func @transform_2(%arg0: i32) -> (i32, i32) {
    %c0_i32 = arith.constant 0 : i32
    %c0_i32_0 = arith.constant 0 : i32
    %c0_i32_1 = arith.constant 0 : i32
    return %c0_i32, %c0_i32_0 : i32, i32
  }
}

</mosaic_0001>

<bundles_post_ra>
// kernel: tpu_custom_call.1
= control target key start
LH: loop header
LB: loop body
LE: loop exit
PB: predicated region body
PF: predicated region fallthrough
CT: control target
= control target key end

     0   :  { %7 = vsyncpa [#allocation4], 0  ;;  %s199_s0 = inlined_call_operand.hbm [shape: f32[16,128], index: 0, kind: input, shape index: {}]   ;;  %s200_s1 = inlined_call_operand.hbm [shape: f32[16,128], index: 1, kind: input, shape index: {}]   ;;  %s201_s2 = inlined_call_operand.hbm [shape: f32[1,1], index: 2, kind: output, shape index: {}]  }
   0x1   :  { %8 = vsyncpa [#allocation7], 0 }
   0x2   :  { %9 = vsyncpa [#allocation5], 0  ;;  %s170_s9 = smov [#allocation3]  }
   0x3   :  { %s15_s10 = sshll.u32 %s170_s9, 4  ;;  %s16_s10 = int_to_ptr.vmem [resolvable:$true] %s15_s10 }
   0x4   :  { %s124_s11 = scalar_lea.vmem %s16_s10, 256  ;;  %p129_p1 = scmp.lt.s32.totalorder %s16_s10, %s16_s10 }
   0x5   :  { %p125_p0 = scmp.ne.s32.totalorder %s16_s10, %s124_s11  ;;  %p130_p2 = scmp.lt.s32.totalorder %s124_s11, %s124_s11 }
   0x7   :  { %p131_p3 = por %p130_p2, %p129_p1 }
   0x9   :  { %p132_p4 = pnand %p131_p3, %p125_p0 }
   0xb   :  { %135 = shalt.err (!%p132_p4)
}
   0xc   :  { %s171_s12 = smov 128   ;;  %s172_s13 = smov 8  }
   0xd   :  { %21 = dma.hbm_to_vmem [thread:$0]  %s199_s0, 256, %s16_s10, [#allocation4], %s171_s12, %s171_s12, %s172_s13  }
   0xe   :  { %s173_s16 = smov [#allocation6]  }
   0xf   :  { %s27_s17 = sshll.u32 %s173_s16, 4  ;;  %s28_s17 = int_to_ptr.vmem [resolvable:$true] %s27_s17 }
  0x10   :  { %s144_s18 = scalar_lea.vmem %s28_s17, 256  ;;  %p149_p6 = scmp.lt.s32.totalorder %s28_s17, %s28_s17 }
  0x11   :  { %p145_p5 = scmp.ne.s32.totalorder %s28_s17, %s144_s18  ;;  %p150_p7 = scmp.lt.s32.totalorder %s144_s18, %s144_s18 }
  0x13   :  { %p151_p8 = por %p150_p7, %p149_p6 }
  0x15   :  { %p152_p9 = pnand %p151_p8, %p145_p5 }
  0x17   :  { %155 = shalt.err (!%p152_p9)
}
  0x18   :  { %33 = dma.hbm_to_vmem [thread:$0]  %s200_s1, 256, %s28_s17, [#allocation7], %s171_s12, %s171_s12, %s172_s13  }
  0x19   :  { %164 = dma.done.wait [#allocation4], 256  }
  0x1a   :  { %165 = vsyncadd [#allocation4], 4294967040 }
  0x1b   :  { %166 = dma.done.wait [#allocation7], 256  }
  0x1c   :  { %167 = vsyncadd [#allocation7], 4294967040  ;;  %v46_v0 = vld [vmem:[#allocation3] sm:$0xff]  ;;  %v47_v1 = vld [vmem:[#allocation3 + $0x8] sm:$0xff]  ;;  %s174_s23 = smov [#allocation8]  }
  0x1d   :  { %v48_v2 = vld [vmem:[#allocation6] sm:$0xff]  ;;  %v49_v3 = vld [vmem:[#allocation6 + $0x8] sm:$0xff] }
  0x1e   :  { %v50_v4 = vsub.f32 %v46_v0, %v48_v2  ;;  %v51_v5 = vsub.f32 %v47_v1, %v49_v3 }
  0x20   :  { %v52_v6 = vmul.f32 %v50_v4, %v50_v4  ;;  %v53_v7 = vmul.f32 %v51_v5, %v51_v5 }
  0x22   :  { %v67_v8 = vadd.f32 %v53_v7, %v52_v6 }
  0x24   :  { %68 = vadd.xlane.f32.xlu0 %v67_v8 }
  0xad   :  { %v69_v9 = vpop.xlane.xlu0 %68 }
  0xae   :  { %v70_v10 = vrot.slane %v69_v9, 4 }
  0xb0   :  { %v71_v11 = vadd.f32 %v70_v10, %v69_v9 }
  0xb2   :  { %v72_v12 = vrot.slane %v71_v11, 2 }
  0xb4   :  { %v73_v13 = vadd.f32 %v72_v12, %v71_v11 }
  0xb6   :  { %v74_v14 = vrot.slane %v73_v13, 1 }
  0xb8   :  { %v75_v15 = vadd.f32 %v74_v14, %v73_v13 }
  0xba   :  { %105 = vpush %v75_v15 }
  0xeb   :  { %s106_s0 = spop %105 }
  0xec   :  { %s77_s1 = smul.f32 0.00048828125, %s106_s0 }
  0xee   :  { %s78_s21 = sadd.f32 1e-06, %s77_s1 }
  0xf0   :  { %v79_v16 = vstv %s78_s21 }
  0xf1   :  { %114 = vrsqrt.f32 %v79_v16  ;;  %vm82_vm0 = vcmp.eq.f32.partialorder %v79_v16, inf  ;;  %v85_v19 = vand.u32 2147483648, %v79_v16  ;;  %vm84_vm1 = vcmp.eq.f32.partialorder %v79_v16, 0.0 }
  0xfe   :  { %v115_v17 = vpop.eup %114 }
  0xff   :  { %v81_v18 = vmul.f32 %v115_v17, %v79_v16 }
 0x101   :  { %v83_v20 = vsel %vm82_vm0, %v79_v16, %v81_v18 }
 0x102   :  { %v86_v21 = vsel %vm84_vm1, %v85_v19, %v83_v20 }
 0x103   :  { %107 = vpush %v86_v21 }
 0x134   :  { %s108_s22 = spop %107 }
 0x135   :  { %89 = sst [smem:[#allocation8]] %s108_s22 }
 0x136   :  { %97 = dma.smem_to_hbm %s174_s23, 16, %s201_s2, [#allocation5]  }
 0x137   :  { %168 = dma.done.wait [#allocation5], 16  }
 0x138   :  { %169 = vsyncadd [#allocation5], 4294967280 }
 0x139   :  { %101 = sfence }
 0x13a   :  { %102 = vsyncpa [#allocation4], 1 }
 0x13b   :  { %103 = vsyncpa [#allocation7], 1 }
 0x13c   :  { %104 = vsyncpa [#allocation5], 1 }

</bundles_post_ra>
